<compile_context>
chip_gen: v5e
topology: v5e:2x2
jax: 0.10.0
libtpu: 0.0.40
codegen_flags: <defaults>
</compile_context>

<pallas_src>
import functools

import jax
import jax.numpy as jnp
from jax.experimental import pallas as pl
from jax.experimental.pallas import tpu as pltpu


def _maxpool_kernel(x_ref, o_ref, *scratch,
                    kernel_size, stride, padding, out_h, out_w, fill_value):
    # x_ref: (bb, H, W)   -- W on the 128-lane axis, H on sublanes, bb major.
    # o_ref: (bb, out_h, out_w)
    kh, kw = kernel_size
    sh, sw = stride
    ph, pw = padding

    if ph or pw:
        # In-kernel padding: fill a VMEM scratch slab with the identity for max
        # and drop the real tile into its interior (no wrapper-side jnp.pad /
        # extra HBM pass).
        pad_ref = scratch[0]
        bb, h, w = x_ref.shape
        pad_ref[...] = jnp.full(pad_ref.shape, fill_value, pad_ref.dtype)
        pad_ref[:, ph:ph + h, pw:pw + w] = x_ref[...]
        src = pad_ref
    else:
        src = x_ref

    bb = src.shape[0]
    w_extent = sw * (out_w - 1) + kw   # input columns actually needed
    n_slide = sw * (out_w - 1) + 1     # sliding-max positions needed

    # ---- Stage 1: reduce over kh (rows).  Strided loads touch only the
    # sublane (H) axis; the lane axis (W) is read densely.
    def h_tap(ki):
        if sh == 1:
            return src[:, ki:ki + out_h, 0:w_extent]
        return src[:, pl.ds(ki, out_h, stride=sh), 0:w_extent]

    row = h_tap(0)
    for ki in range(1, kh):
        row = jnp.maximum(row, h_tap(ki))          # (bb, out_h, w_extent)

    # ---- Stage 2: sliding max over kw via unit-stride lane shifts (VPU).
    slide = row[:, :, 0:n_slide]
    for kj in range(1, kw):
        slide = jnp.maximum(slide, row[:, :, kj:kj + n_slide])   # (bb, out_h, n_slide)

    # ---- Stage 3: subsample every sw-th column.  Lane-strided slices are not
    # used; instead select columns with a one-hot matrix on the (otherwise
    # idle) MXU: out[..., o] = slide[..., o * sw].  Exact for float dtypes.
    if sw == 1:
        out = slide
    else:
        if jnp.issubdtype(o_ref.dtype, jnp.floating):
            # Keep the 0 * inf = NaN case out of the selection matmul.
            finfo = jnp.finfo(o_ref.dtype)
            slide = jnp.clip(slide, finfo.min, finfo.max)
        w_idx = jax.lax.broadcasted_iota(jnp.int32, (bb, n_slide, out_w), 1)
        o_idx = jax.lax.broadcasted_iota(jnp.int32, (bb, n_slide, out_w), 2)
        sel = (w_idx == o_idx * sw).astype(jnp.float32)
        # TODO(synk): integer dtypes with stride > 1 go through f32 selection
        # (exact only up to 2**24); switch to a lane gather once available.
        out = jnp.einsum("bhw,bwo->bho", slide.astype(jnp.float32), sel,
                         precision=jax.lax.Precision.HIGHEST,
                         preferred_element_type=jnp.float32)

    o_ref[...] = out.astype(o_ref.dtype)


def maxpool2d(x, kernel_size, stride=None, padding=0):
    """Equivalent of torch.nn.MaxPool2d(kernel_size, stride, padding) on NCHW.

    ceil_mode / dilation are not supported (the module uses the defaults).
    """
    if isinstance(kernel_size, int):
        kernel_size = (kernel_size, kernel_size)
    if stride is None:
        stride = kernel_size
    if isinstance(stride, int):
        stride = (stride, stride)
    if isinstance(padding, int):
        padding = (padding, padding)

    n, c, h, w = x.shape
    kh, kw = kernel_size
    sh, sw = stride
    ph, pw = padding

    out_h = (h + 2 * ph - kh) // sh + 1
    out_w = (w + 2 * pw - kw) // sw + 1
    assert out_h > 0 and out_w > 0, "empty pooling output"

    if jnp.issubdtype(x.dtype, jnp.floating):
        fill = float(jnp.finfo(x.dtype).min)
    else:
        fill = int(jnp.iinfo(x.dtype).min)

    # Free reshape: merge N and C (no data movement) so channels ride the grid
    # axis and W stays on lanes inside the kernel.
    bc = n * c
    xr = x.reshape(bc, h, w)

    hp, wp = h + 2 * ph, w + 2 * pw
    w_extent = sw * (out_w - 1) + kw
    n_slide = sw * (out_w - 1) + 1
    itemsize = jnp.dtype(x.dtype).itemsize

    # Per-(N*C)-row VMEM accounting: double-buffered in/out blocks, padded
    # scratch, separable-max temporaries and the f32 selection operands.
    in_row = h * w * itemsize
    out_row = out_h * out_w * itemsize
    pad_row = hp * wp * itemsize if (ph or pw) else 0
    tmp_row = 2 * out_h * w_extent * itemsize + 2 * out_h * n_slide * 4
    sel_row = (n_slide * out_w + out_h * out_w) * 4 if sw > 1 else 0
    per_row = 2 * (in_row + out_row) + pad_row + tmp_row + sel_row

    # Conservative block budget (v7x: 64 MiB VMEM, 32 MiB scoped default).
    budget = 3 * 1024 * 1024
    bb_budget = max(1, budget // per_row)
    # Keep >= ~8 grid steps so pipelining overlap and megacore sharding exist.
    bb_steps = max(1, bc // 8)
    bb_cap = max(1, min(bb_budget, bb_steps))
    bb = 1
    for d in range(1, int(bb_cap) + 1):
        if bc % d == 0:
            bb = d
    grid = (bc // bb,)
    # TODO(synk): add an H grid axis for very large spatial extents where a
    # single (H, W) slab per row exceeds the VMEM budget; and pack multiple W
    # rows onto the lane axis when W is very small (lane density).

    scratch_shapes = []
    if ph or pw:
        scratch_shapes.append(pltpu.VMEM((bb, hp, wp), x.dtype))

    kernel = functools.partial(
        _maxpool_kernel,
        kernel_size=(kh, kw),
        stride=(sh, sw),
        padding=(ph, pw),
        out_h=out_h,
        out_w=out_w,
        fill_value=fill,
    )

    vmem_limit = int(min(64 * 1024 * 1024,
                         max(32 * 1024 * 1024, 2 * per_row * bb)))

    out = pl.pallas_call(
        kernel,
        out_shape=jax.ShapeDtypeStruct((bc, out_h, out_w), x.dtype),
        grid_spec=pltpu.PrefetchScalarGridSpec(
            num_scalar_prefetch=0,
            grid=grid,
            in_specs=[pl.BlockSpec((bb, h, w), lambda i: (i, 0, 0))],
            out_specs=pl.BlockSpec((bb, out_h, out_w), lambda i: (i, 0, 0)),
            scratch_shapes=tuple(scratch_shapes),
        ),
        compiler_params=pltpu.CompilerParams(
            dimension_semantics=("parallel",),
            vmem_limit_bytes=vmem_limit,
        ),
    )(xr)

    # Free reshape back to NCHW (no transpose, no extra HBM pass).
    return out.reshape(n, c, out_h, out_w)


def maxpool2d_ref(x, kernel_size, stride=None, padding=0):
    """Pure-JAX reference (reduce_window), same semantics as nn.MaxPool2d."""
    if isinstance(kernel_size, int):
        kernel_size = (kernel_size, kernel_size)
    if stride is None:
        stride = kernel_size
    if isinstance(stride, int):
        stride = (stride, stride)
    if isinstance(padding, int):
        padding = (padding, padding)
    if jnp.issubdtype(x.dtype, jnp.floating):
        init = -jnp.inf
    else:
        init = jnp.iinfo(x.dtype).min
    return jax.lax.reduce_window(
        x, init, jax.lax.max,
        window_dimensions=(1, 1) + tuple(kernel_size),
        window_strides=(1, 1) + tuple(stride),
        padding=((0, 0), (0, 0),
                 (padding[0], padding[0]), (padding[1], padding[1])),
    )


if __name__ == "__main__":
    key = jax.random.PRNGKey(0)
    # Small NCHW input consistent with the module's forward.
    x = jax.random.normal(key, (2, 4, 16, 16), dtype=jnp.float32)

    # MaxPool2D(kernel_size=2) -> stride=2, padding=0 (module defaults).
    out = jax.block_until_ready(maxpool2d(x, kernel_size=2))
    ref = maxpool2d_ref(x, kernel_size=2)
    assert out.shape == (2, 4, 8, 8), out.shape
    assert jnp.allclose(out, ref), "mismatch vs reference (k=2, s=2, p=0)"

    # Overlapping windows + in-kernel padding path (k=3, s=2, p=1).
    out2 = jax.block_until_ready(maxpool2d(x, kernel_size=3, stride=2, padding=1))
    ref2 = maxpool2d_ref(x, kernel_size=3, stride=2, padding=1)
    assert out2.shape == ref2.shape, (out2.shape, ref2.shape)
    assert jnp.allclose(out2, ref2), "mismatch vs reference (k=3, s=2, p=1)"

    print("KERNEL_OK")
</pallas_src>

<mosaic_0001>
module attributes {stable_mosaic.version = 11 : i64} {
  func.func @_maxpool_kernel(%arg0: i32, %arg1: memref<1x16x16xf32, #tpu.memory_space<vmem>>, %arg2: memref<1x8x8xf32, #tpu.memory_space<vmem>>) attributes {dimension_semantics = [#tpu.dimension_semantics<parallel>], iteration_bounds = array<i64: 8>, scalar_prefetch = 0 : i64, scratch_operands = 0 : i64, tpu.core_type = #tpu.core_type<tc>, window_params = [{transform_indices = @transform_0, window_bounds = array<i64: 1, 16, 16>}, {transform_indices = @transform_1, window_bounds = array<i64: 1, 8, 8>}]} {
    %c0 = arith.constant 0 : index
    %c0_0 = arith.constant 0 : index
    %c0_1 = arith.constant 0 : index
    %0 = tpu.strided_load %arg1[%c0, %c0_0, %c0_1] {strides = array<i32: 1, 2, 1>} : memref<1x16x16xf32, #tpu.memory_space<vmem>>, vector<1x8x16xf32>
    %c0_2 = arith.constant 0 : index
    %c1 = arith.constant 1 : index
    %c0_3 = arith.constant 0 : index
    %1 = tpu.strided_load %arg1[%c0_2, %c1, %c0_3] {strides = array<i32: 1, 2, 1>} : memref<1x16x16xf32, #tpu.memory_space<vmem>>, vector<1x8x16xf32>
    %2 = arith.maximumf %0, %1 : vector<1x8x16xf32>
    %3 = vector.extract_strided_slice %2 {offsets = [0, 0, 0], sizes = [1, 8, 15], strides = [1, 1, 1]} : vector<1x8x16xf32> to vector<1x8x15xf32>
    %4 = vector.extract_strided_slice %2 {offsets = [0, 0, 1], sizes = [1, 8, 15], strides = [1, 1, 1]} : vector<1x8x16xf32> to vector<1x8x15xf32>
    %5 = arith.maximumf %3, %4 : vector<1x8x15xf32>
    %cst = arith.constant -3.40282347E+38 : f32
    %cst_4 = arith.constant 3.40282347E+38 : f32
    %6 = vector.broadcast %cst : f32 to vector<1x8x15xf32>
    %7 = arith.maximumf %6, %5 : vector<1x8x15xf32>
    %8 = vector.broadcast %cst_4 : f32 to vector<1x8x15xf32>
    %9 = arith.minimumf %8, %7 : vector<1x8x15xf32>
    %10 = tpu.iota {dimensions = array<i32: 1>} : vector<1x15x8xi32>
    %11 = tpu.iota {dimensions = array<i32: 2>} : vector<1x15x8xi32>
    %c2_i32 = arith.constant 2 : i32
    %12 = vector.broadcast %c2_i32 : i32 to vector<1x15x8xi32>
    %13 = arith.muli %11, %12 : vector<1x15x8xi32>
    %14 = arith.cmpi eq, %10, %13 : vector<1x15x8xi32>
    %15 = arith.extui %14 : vector<1x15x8xi1> to vector<1x15x8xi32>
    %16 = arith.sitofp %15 : vector<1x15x8xi32> to vector<1x15x8xf32>
    "tpu.trace_start"() <{level = 10 : i32, message = "bhw,bwo->bho"}> : () -> ()
    %cst_5 = arith.constant dense<0.000000e+00> : vector<1x8x8xf32>
    %17 = tpu.matmul %9, %16, %cst_5 {dimension_numbers = #tpu.dot_dimension_numbers<[2], [1], [1], [2], [0, 0, 0, 1, 1, 2], [0], [0]>, precision = #tpu.contract_precision<fp32>} : vector<1x8x15xf32>, vector<1x15x8xf32>, vector<1x8x8xf32> -> vector<1x8x8xf32>
    "tpu.trace_stop"() : () -> ()
    %c0_6 = arith.constant 0 : index
    %c0_7 = arith.constant 0 : index
    %c0_8 = arith.constant 0 : index
    %18 = vector.load %arg2[%c0_6, %c0_7, %c0_8] : memref<1x8x8xf32, #tpu.memory_space<vmem>>, vector<1x8x8xf32>
    tpu.vector_store %arg2[%c0_6, %c0_7, %c0_8], %17 {strides = array<i32>} : memref<1x8x8xf32, #tpu.memory_space<vmem>>, vector<1x8x8xf32>,
    return
  }
  func.func @transform_0(%arg0: i32) -> (i32, i32, i32) {
    %c0_i32 = arith.constant 0 : i32
    %c0_i32_0 = arith.constant 0 : i32
    %c0_i32_1 = arith.constant 0 : i32
    return %arg0, %c0_i32, %c0_i32_0 : i32, i32, i32
  }
  func.func @transform_1(%arg0: i32) -> (i32, i32, i32) {
    %c0_i32 = arith.constant 0 : i32
    %c0_i32_0 = arith.constant 0 : i32
    %c0_i32_1 = arith.constant 0 : i32
    return %arg0, %c0_i32, %c0_i32_0 : i32, i32, i32
  }
}

</mosaic_0001>

<bundles_post_ra>
// kernel: tpu_custom_call.1
= control target key start
LH: loop header
LB: loop body
LE: loop exit
PB: predicated region body
PF: predicated region fallthrough
CT: control target
= control target key end

     0   :  { %6 = vsyncpa [#allocation3], 0  ;;  %s745_s0 = inlined_call_operand.hbm [shape: f32[8,16,16], index: 0, kind: input, shape index: {}]   ;;  %s746_s1 = inlined_call_operand.hbm [shape: f32[8,8,8], index: 1, kind: output, shape index: {}]  }
   0x1   :  { %8 = vsyncpa [#allocation3 + $0x1], 0 }
   0x2   :  { %9 = vsyncpa [#allocation4], 0 }
   0x3   :  { %11 = vsyncpa [#allocation4 + $0x1], 0  ;;  %s603_s6 = smov 0   ;;  %s605_s7 = smov 0  }
   0x4   :  { %s607_s8 = smov 0   ;;  %s609_s9 = smov 0  }
   0x5 LB: > { %s624_s10 = sadd.s32 4294967295, %s586_s9   ;;  %s415_s11 = sadd.s32 4294967294, %s586_s9   ;;  %s586_s9 = sphi %s609_s9, %s757_s9   ;;  %s582_s8 = sphi %s607_s8, %s756_s8   ;;  %s578_s7 = sphi %s605_s7, %s755_s7   ;;  %s574_s6 = sphi %s603_s6, %s754_s6  }
   0x6   : > { %s628_s12 = sadd.s32 1, %s586_s9   ;;  %s24_s13 = sadd.s32 1, %s582_s8 }
   0x7   : > { %s21_s14 = ssub.s32 %s586_s9, %s628_s12  ;;  %p31_p0 = scmp.ne.s32.totalorder %s582_s8, %s578_s7 }
   0x8   : > { %p22_p1 = scmp.eq.s32.totalorder %s21_s14, 0  ;;  %p32_p2 = scmp.eq.s32.totalorder %s586_s9, 0 }
   0x9   : > { %p37_p3 = scmp.ne.s32.totalorder %s578_s7, %s574_s6  ;;  %p38_p4 = scmp.eq.s32.totalorder %s624_s10, 0 }
   0xa   : > { %s640_s15 = scalar_select %p22_p1, %s582_s8, %s24_s13  }
   0xb   : > { %p642_p5 = por %p32_p2, %p31_p0  ;;  %p646_p6 = por %p38_p4, %p37_p3 }
   0xc   : > { %p61_p7 = scmp.eq.s32.totalorder %s624_s10, 7  ;;  %p67_p8 = scmp.eq.s32.totalorder %s415_s11, 7 }
   0xd   : > { %p451_p9 = scmp.lt.s32.totalorder %s586_s9, 8  ;;  %s87_s20 = sand.u32 1, %s582_s8  }
   0xe   : > { %p652_p10 = por %p61_p7, %p31_p0  ;;  %p656_p11 = por %p67_p8, %p37_p3 }
   0xf   : > { %s438_s21 = sshll.u32 %s586_s9, 4  ;;  %s418_s22 = sshll.u32 %s87_s20, 4 }
  0x10   : > { %s96_s25 = scalar_lea.hbm %s745_s0, %s438_s21  ;;  %s91_s27 = scalar_lea.vmem [#allocation2], %s418_s22 }
  0x11   : > { %s97_s26 = sshll.u32 %s96_s25, 4  ;;  %s99_s28 = sshll.u32 %s91_s27, 4  ;;  %s98_s26 = int_to_ptr.hbm [resolvable:$true] %s97_s26  ;;  %s100_s28 = int_to_ptr.vmem [resolvable:$true] %s99_s28 }
  0x12   : > { %p667_p12 = pnand %p451_p9, %p642_p5  ;;  %p421_p13 = scmp.ge.s32.totalorder %s586_s9, 1 }
  0x13   : > { %p107_p0 = scmp.lt.s32.totalorder %s586_s9, 9  ;;  %s88_s30 = scalar_lea.sflag [#allocation3], %s87_s20 }
  0x14   : > { %s490_s2 = sshra.s32 %s98_s26, 4  ;;  %p494_p2 = pneg %p667_p12  ;;  %s491_s2 = int_to_ptr.hbm [resolvable:$true] %s490_s2 }
  0x15   : > { %s492_s3 = scalar_lea.hbm %s491_s2, 16  ;;  %s497_s11 = scalar_lea.hbm %s745_s0, 128 }
  0x16   : > { %p493_p1 = scmp.ne.s32.totalorder %s491_s2, %s492_s3  ;;  %p498_p5 = scmp.lt.s32.totalorder %s491_s2, %s745_s0 }
  0x17   : > { %p499_p7 = scmp.lt.s32.totalorder %s497_s11, %s492_s3 }
  0x18   : > { %p495_p3 = pnand %p494_p2, %p493_p1 }
  0x19   : > { %p500_p8 = por %p499_p7, %p498_p5 }
  0x1a   : > { %p496_p4 = pneg %p495_p3 }
  0x1c   : > { %p501_p9 = pnand %p500_p8, %p496_p4 }
  0x1e   : > { %504 = shalt.err (!%p501_p9)
}
  0x1f   : > { %s588_s16 = smov 128   ;;  %s589_s20 = smov 8  }
  0x20   : > { %446 = dma.hbm_to_vmem [thread:$0]  (!%p667_p12), %s98_s26, 256, %s100_s28, %s88_s30, %s588_s16, %s588_s16, %s589_s20  }
  0x21   : > { %p108_p1 = pnand %p421_p13, %p107_p0 }
  0x22   : > { %s688_s21 = sand.u32 (!%p108_p1), 1, %s578_s7  }
  0x23   : > { %111 = sbr.rel (%p108_p1) target bundleno = 315 (0x13b), region = 24  ;;  %s422_s22 = sshll.u32 (!%p108_p1), %s688_s21, 4 }
  0x24   : > { %s114_s23 = scalar_lea.sflag (!%p108_p1), [#allocation3], %s688_s21  ;;  %s117_s24 = scalar_lea.vmem (!%p108_p1), [#allocation2], %s422_s22 }
  0x28   : > { %565 = dma.done.wait (%p646_p6), %s114_s23, 256  }
  0x29   : > { %567 = vsyncadd (%p646_p6), %s114_s23, 4294967040  ;;  %v137_v0 = vld [vmem:[%s117_s24] ss:$2 sm:$0xff]  ;;  %v424_v1 = vld [vmem:[%s117_s24 + $0x1] ss:$2 sm:$0xff]  ;;  %s590_s25 = smov 127   ;;  %v148_v3 = vlaneseq }
  0x2a   : > { %v140_v2 = vmax.f32 %v137_v0, %v424_v1  ;;  %v591_v8 = vmov 0.0   ;;  %vm164_vm1 = vcmask 1046528   ;;  %v592_v21 = vmov 1.0   ;;  %s423_s17 = sshll.u32 %s688_s21, 3  ;;  %s435_s26 = sshll.u32 %s624_s10, 3 }
  0x2b   : > { %v149_v4 = vshrl.u32 %v148_v3, 7  ;;  %v152_v5 = vand.u32 127, %v148_v3  ;;  %vm160_vm3 = vcmask 121856   ;;  %s340_s29 = scalar_lea.hbm %s746_s1, %s435_s26  ;;  %s136_s30 = scalar_lea.vmem [#allocation5], %s423_s17  ;;  %vm327_vm4 = vcmask 64512  }
  0x2c   : > { %142 = vrot.lane.b32.xlu0 %v140_v2, %s590_s25  ;;  %s342_s2 = sshll.u32 %s136_s30, 4  ;;  %s344_s3 = sshll.u32 %s340_s29, 4  ;;  %s343_s2 = int_to_ptr.vmem [resolvable:$true] %s342_s2  ;;  %s345_s3 = int_to_ptr.hbm [resolvable:$true] %s344_s3 }
  0x2d   : > { %v150_v6 = vadd.s32 8, %v149_v4  ;;  %v153_v7 = vmul.u32 2, %v152_v5  ;;  %s330_s10 = scalar_lea.sflag [#allocation4], %s688_s21  ;;  %s534_s4 = sshra.s32 %s345_s3, 4  ;;  %s535_s4 = int_to_ptr.hbm [resolvable:$true] %s534_s4 }
  0x2e   : > { %s536_s5 = scalar_lea.hbm %s535_s4, 8  ;;  %s540_s14 = scalar_lea.hbm %s746_s1, 64 }
  0x2f   : > { %vm155_vm0 = vcmp.eq.s32.totalorder %v150_v6, %v153_v7  ;;  %vm699_vm2 = vcmp.eq.s32.totalorder %v149_v4, %v153_v7  ;;  %p537_p6 = scmp.ne.s32.totalorder %s535_s4, %s536_s5  ;;  %p541_p0 = scmp.lt.s32.totalorder %s535_s4, %s746_s1 }
  0x30   : > { %v427_v9 = vsel %vm155_vm0, 1.0, %v591_v8  ;;  %v426_v13 = vsel %vm699_vm2, 1.0, %v591_v8  ;;  %p542_p2 = scmp.lt.s32.totalorder %s540_s14, %s536_s5 }
  0x31   : > { %v166_v10 = vsel %vm164_vm1, %v427_v9, 0  ;;  %430 = vmatpush.msk.msra.mxu3 %vm164_vm1, %v427_v9  ;;  %428 = vmatpush.msk.msra.mxu0 %vm164_vm1, %v427_v9  ;;  %v216_v15 = vsub.f32 %v426_v13, %v426_v13  ;;  %p538_p12 = pnand %p537_p6, %p652_p10 }
  0x32   : > { %v210_v11 = vsub.f32 %v166_v10, %v166_v10  ;;  %p543_p3 = por %p542_p2, %p541_p0 }
  0x33   : > { %v217_v17 = vand.u32 4294901760, %v216_v15  ;;  %431 = vmatpush.msk.msra.mxu3 %vm699_vm2, %v592_v21  ;;  %429 = vmatpush.msk.msra.mxu0 %vm699_vm2, %v592_v21  ;;  %p539_p13 = pneg %p538_p12 }
  0x34   : > { %v211_v14 = vand.u32 4294901760, %v210_v11  ;;  %242 = vmatpush.msra.mxu2 %v210_v11 }
  0x35   : > { %v218_v19 = vsub.f32 %v216_v15, %v217_v17  ;;  %p544_p4 = pnand %p543_p3, %p539_p13 }
  0x36   : > { %v212_v16 = vsub.f32 %v210_v11, %v211_v14  ;;  %245 = vmatpush.msra.mxu2 %v216_v15  ;;  %294 = vmatpush.msrb.mxu0 %v211_v14 }
  0x37   : > { %v219_v20 = vand.u32 4294901760, %v218_v19 }
  0x38   : > { %v213_v18 = vand.u32 4294901760, %v212_v16  ;;  %298 = vmatpush.msrb.mxu0 %v217_v17 }
  0x3a   : > { %214 = vmatpush.msra.mxu1 %v213_v18 }
  0x3c   : > { %220 = vmatpush.msra.mxu1 %v219_v20 }
  0x3e   : > { %432 = vmatpush.msk.msrb.mxu1 %vm164_vm1, %v427_v9 }
  0x40   : > { %433 = vmatpush.msk.msrb.mxu1 %vm699_vm2, %v592_v21 }
  0x9e   : > { %v143_v22 = vpop.permute.xlu0 %142 }
  0x9f   : > { %v145_v23 = vmax.f32 %v140_v2, %v143_v22 }
  0xa1   : > { %v425_v24 = vclamps-f32 %v145_v23, 3.4028235e+38 }
  0xa3   : > { %v162_v25 = vsel %vm160_vm3, %v425_v24, 0 }
  0xa4   : > { %v186_v26 = vand.u32 4294901760, %v162_v25 }
  0xa6   : > { %222 = vmatmul.f32.vlgmr.msra.gmra.mxu1 %v186_v26  ;;  %v187_v27 = vsub.f32 %v162_v25, %v186_v26 }
  0xa8   : > { %248 = vmatmul.f32.vlgmr.msra.gmra.mxu2 %v187_v27  ;;  %v188_v28 = vand.u32 4294901760, %v187_v27 }
  0xaa   : > { %273 = vmatmul.f32.vlgmr.msra.gmra.mxu3 %v188_v28  ;;  %v189_v29 = vsub.f32 %v187_v27, %v188_v28 }
  0xac   : > { %v190_v30 = vand.u32 4294901760, %v189_v29 }
  0xae   : > { %191 = vmatmul.f32.vlgmr.msra.gmra.mxu0 %v190_v30  ;;  %323 = vmatmul.f32.vlgmr.msrb.gmra.mxu1 %v186_v26 }
  0xb6   : > { %300 = vmatmul.f32.vlgmr.msrb.gmra.mxu0 %v186_v26 }
 0x123   : > { %v223_v31 = vpop.f32.mrf.mxu1 }
 0x12b   : > { %v192_v32 = vpop.f32.mrf.mxu0  ;;  %v249_v34 = vpop.f32.mrf.mxu2 }
 0x12c   : > { %v224_v33 = vadd.f32 %v223_v31, %v192_v32  ;;  %v324_v40 = vpop.f32.mrf.mxu1 }
 0x12d   : > { %v274_v36 = vpop.f32.mrf.mxu3 }
 0x12e   : > { %v250_v35 = vadd.f32 %v249_v34, %v224_v33 }
 0x130   : > { %v275_v37 = vadd.f32 %v274_v36, %v250_v35 }
 0x133   : > { %v301_v38 = vpop.f32.mrf.mxu0 }
 0x134   : > { %v302_v39 = vadd.f32 %v301_v38, %v275_v37 }
 0x136   : > { %v325_v41 = vadd.f32 %v324_v40, %v302_v39 }
 0x138   : > { %328 = vst.msk [vmem:[%s136_s30] sm:$0xff] %vm327_vm4, %v325_v41 }
 0x139   : > { %547 = shalt.err (!%p544_p4)
}
 0x13a   : > { %441 = dma.vmem_to_hbm [thread:$0]  (%p652_p10), %s343_s2, 128, %s345_s3, %s330_s10  }
 0x13b PF: > { %p452_p5 = scmp.ge.s32.totalorder %s586_s9, 2  ;;  %s356_s21 = sand.u32 1, %s574_s6  }
 0x13c   : > { %s357_s22 = scalar_lea.sflag [#allocation4], %s356_s21 }
 0x13d   : > { %p448_p7 = pnand %p452_p5, %p656_p11 }
 0x13f   : > { %p449_p8 = pneg %p448_p7 }
 0x141   : > { %569 = dma.done.wait (%p449_p8), %s357_s22, 128  }
 0x142   : > { %571 = vsyncadd (%p449_p8), %s357_s22, 4294967168  ;;  %p14_p9 = scmp.ge.s32.totalorder %s628_s12, 10   ;;  %s754_s6 = smov %s578_s7 }
 0x143   : > { %s755_s7 = smov %s582_s8  ;;  %s756_s8 = smov %s640_s15 }
 0x144   : > { %s757_s9 = smov %s628_s12  ;;  %16 = sbr.rel (!%p14_p9) target bundleno = 5 (0x5), region = 70 }
 0x149   :  { %363 = vsyncpa [#allocation3], 1 }
 0x14a   :  { %365 = vsyncpa [#allocation3 + $0x1], 1 }
 0x14b   :  { %366 = vsyncpa [#allocation4], 1 }
 0x14c   :  { %368 = vsyncpa [#allocation4 + $0x1], 1 }

</bundles_post_ra>
